<compile_context>
chip_gen: v5e
topology: v5e:2x2
jax: 0.10.0
libtpu: 0.0.40
codegen_flags: <defaults>
</compile_context>

<pallas_src>
import functools

import jax
import jax.numpy as jnp
from jax.experimental import pallas as pl
from jax.experimental.pallas import tpu as pltpu


# ----------------------------------------------------------------------------
# Kernel 1: fused GCN + semantic-attention partial score.
#   grid = (NI, P, NK); per (i, p): acc = sum_k adj[p, i, k] @ h[k]  (bf16 MXU)
#   at the last k: embed = PReLU(acc @ W_p + b_p) (stored bf16) and the partial
#   score  att . sum_rows(tanh(embed @ Wfc + bfc))  is emitted lane-dense.
# ----------------------------------------------------------------------------
def gcn_score_kernel(a_ref, adj_ref, h_ref, w_ref, b_ref, wfc_ref, bfc_ref,
                     att_ref, emb_ref, sp_ref, acc_ref):
    p = pl.program_id(1)
    k = pl.program_id(2)

    @pl.when(k == 0)
    def _():
        acc_ref[...] = jnp.zeros_like(acc_ref)

    # (adj_p @ h) accumulated over K tiles — bf16 inputs, f32 accumulation.
    acc_ref[...] += jnp.dot(adj_ref[0], h_ref[...],
                            preferred_element_type=jnp.float32)

    @pl.when(k == pl.num_programs(2) - 1)
    def _():
        # (adj_p @ h) @ W_p + bias_p  ==  adj_p @ (h @ W_p) + bias_p
        # Epilogue matmul on bf16 MXU inputs, f32 accumulation.
        out = jnp.dot(acc_ref[...].astype(jnp.bfloat16), w_ref[0],
                      preferred_element_type=jnp.float32) + b_ref[0, 0]
        alpha = a_ref[p]                       # per-metapath PReLU slope (SMEM)
        emb = jnp.where(out > 0, out, alpha * out)
        emb_bf = emb.astype(jnp.bfloat16)
        emb_ref[0] = emb_bf                    # bf16 writeback (half the bytes)

        # Fused semantic-attention partial score for this row tile.
        # (The 1/N of the mean is folded in once per p in the wrapper.)
        t = jnp.tanh(jnp.dot(emb_bf, wfc_ref[...],
                             preferred_element_type=jnp.float32) + bfc_ref[...])
        s = jnp.sum(att_ref[...] * t)
        sp_ref[...] = jnp.full(sp_ref.shape, s, dtype=sp_ref.dtype)


def gcn_score_forward(h, W, adj, bias, prelu_a, Wfc, bfc, att, *,
                      tm=1024, tk=1024):
    """h: (N, D); W: (P, D, D) (for h @ W); adj: (P, N, N) (bf16 preferred);
    bias: (P, D); prelu_a: (P,); Wfc: (D, D); bfc: (1, D); att: (1, D).
    Returns embeds (P, N, D) bf16 and per-metapath scores (P,) f32."""
    P, N, _ = adj.shape
    D = h.shape[1]
    TM = N if N <= tm else tm
    TK = N if N <= tk else tk
    assert N % TM == 0 and N % TK == 0, "N must be divisible by the tile sizes"
    NI, NK = N // TM, N // TK

    bias3 = bias.reshape(P, 1, D).astype(jnp.float32)
    # adj should already be bf16 in HBM (cast once where it is built); only
    # cast here as a fallback so semantics are preserved for f32 callers.
    adj_bf = adj if adj.dtype == jnp.bfloat16 else adj.astype(jnp.bfloat16)
    h_bf = h.astype(jnp.bfloat16)            # (N, D): tiny
    W_bf = W.astype(jnp.bfloat16)            # (P, D, D): tiny
    Wfc_bf = Wfc.astype(jnp.bfloat16)        # (D, D): tiny

    grid_spec = pltpu.PrefetchScalarGridSpec(
        num_scalar_prefetch=0,
        grid=(NI, P, NK),
        in_specs=[
            pl.BlockSpec(memory_space=pltpu.MemorySpace.SMEM),            # prelu_a (P,)
            pl.BlockSpec((1, TM, TK), lambda i, p, k: (p, i, k)),         # adj tile
            pl.BlockSpec((TK, D), lambda i, p, k: (k, 0)),                # h tile
            pl.BlockSpec((1, D, D), lambda i, p, k: (p, 0, 0)),           # W_p (bf16)
            pl.BlockSpec((1, 1, D), lambda i, p, k: (p, 0, 0)),           # bias_p
            pl.BlockSpec((D, D), lambda i, p, k: (0, 0)),                 # Wfc (bf16)
            pl.BlockSpec((1, D), lambda i, p, k: (0, 0)),                 # bfc
            pl.BlockSpec((1, D), lambda i, p, k: (0, 0)),                 # att
        ],
        out_specs=(
            pl.BlockSpec((1, TM, D), lambda i, p, k: (p, i, 0)),          # embeds (bf16)
            pl.BlockSpec((1, 1, 1, 128), lambda i, p, k: (p, i, 0, 0)),   # score partials
        ),
        scratch_shapes=[pltpu.VMEM((TM, D), jnp.float32)],
    )
    embeds, sp = pl.pallas_call(
        gcn_score_kernel,
        out_shape=(jax.ShapeDtypeStruct((P, N, D), jnp.bfloat16),
                   jax.ShapeDtypeStruct((P, NI, 1, 128), jnp.float32)),
        grid_spec=grid_spec,
        compiler_params=pltpu.CompilerParams(
            dimension_semantics=("parallel", "parallel", "arbitrary")),
    )(prelu_a, adj_bf, h_bf, W_bf, bias3, Wfc_bf, bfc, att)

    # Reduce per-row-tile partials and fold the mean's 1/N (trivial glue).
    scores = sp[:, :, 0, 0].sum(axis=1) * (1.0 / N)                       # (P,)
    return embeds, scores


# ----------------------------------------------------------------------------
# Kernel 2: beta-weighted sum of the bf16 embeddings, lane-dense row tiles.
# Betas (softmax over P scalars) are precomputed in the wrapper and read from
# SMEM — no per-tile cross-lane reductions.
# ----------------------------------------------------------------------------
def combine_kernel(beta_ref, emb_ref, z_ref, *, P):
    z = beta_ref[0] * emb_ref[0].astype(jnp.float32)
    for p in range(1, P):
        z = z + beta_ref[p] * emb_ref[p].astype(jnp.float32)
    z_ref[...] = z


def combine_forward(embeds, scores, *, tm=2048):
    P, N, D = embeds.shape
    beta = jax.nn.softmax(scores.astype(jnp.float32))          # (P,) tiny glue

    # Lane-dense view: flatten (N, D) -> (R, 128) when possible (free reshape of
    # a contiguous row-major HBM array); fall back to D lanes otherwise.
    lane = 128 if (N * D) % 128 == 0 else D
    R = (N * D) // lane
    emb_r = embeds.reshape(P, R, lane)

    TM = R if R <= tm else tm
    assert R % TM == 0, "flattened row count must be divisible by the tile size"
    NI = R // TM

    kernel = functools.partial(combine_kernel, P=P)
    grid_spec = pltpu.PrefetchScalarGridSpec(
        num_scalar_prefetch=0,
        grid=(NI,),
        in_specs=[
            pl.BlockSpec(memory_space=pltpu.MemorySpace.SMEM),     # beta (P,)
            pl.BlockSpec((P, TM, lane), lambda i: (0, i, 0)),      # embeds row tile
        ],
        out_specs=pl.BlockSpec((TM, lane), lambda i: (i, 0)),
    )
    z_r = pl.pallas_call(
        kernel,
        out_shape=jax.ShapeDtypeStruct((R, lane), jnp.float32),
        grid_spec=grid_spec,
        compiler_params=pltpu.CompilerParams(dimension_semantics=("parallel",)),
    )(beta, emb_r)
    return z_r.reshape(N, D)


# ----------------------------------------------------------------------------
# Mp_encoder forward (glue)
# ----------------------------------------------------------------------------
def mp_encoder_forward(h, mps, W, bias, prelu_a, Wfc, bfc, att):
    embeds, scores = gcn_score_forward(h, W, mps, bias, prelu_a, Wfc, bfc, att)
    return combine_forward(embeds, scores)


# ----------------------------------------------------------------------------
# Pure-JAX (f32) reference for validation
# ----------------------------------------------------------------------------
def reference(h, mps, W, bias, prelu_a, Wfc, bfc, att):
    P = mps.shape[0]
    embeds = []
    for p in range(P):
        fts = h @ W[p]
        out = mps[p] @ fts + bias[p]
        out = jnp.where(out > 0, out, prelu_a[p] * out)
        embeds.append(out)
    scores = []
    for e in embeds:
        sp = jnp.tanh(e @ Wfc + bfc[0]).mean(axis=0)
        scores.append(jnp.sum(att[0] * sp))
    beta = jax.nn.softmax(jnp.stack(scores))
    z = beta[0] * embeds[0]
    for p in range(1, P):
        z = z + beta[p] * embeds[p]
    return z


if __name__ == "__main__":
    P, N, D = 3, 16, 32   # metapaths, nodes, hidden_dim

    key = jax.random.PRNGKey(0)
    k_h, k_adj, k_w, k_wfc, k_bfc, k_att = jax.random.split(key, 6)

    # inputs
    h = jax.random.normal(k_h, (N, D), dtype=jnp.float32)
    adj_raw = jax.random.uniform(k_adj, (P, N, N), dtype=jnp.float32)
    mps = adj_raw / adj_raw.sum(axis=-1, keepdims=True)   # row-normalized dense adjacency
    mps_bf = mps.astype(jnp.bfloat16)   # cast ONCE where the adjacency is built

    # deterministic parameter init (xavier_normal-style, gain=1.414)
    xav = lambda fan_in, fan_out: 1.414 * (2.0 / (fan_in + fan_out)) ** 0.5
    W = (jax.random.normal(k_w, (P, D, D), dtype=jnp.float32) * xav(D, D))     # GCN fc.weight^T
    bias = jnp.zeros((P, D), dtype=jnp.float32)                                 # GCN bias (fill 0)
    prelu_a = jnp.full((P,), 0.25, dtype=jnp.float32)                           # PReLU default slope
    Wfc = (jax.random.normal(k_wfc, (D, D), dtype=jnp.float32) * xav(D, D))     # Attention fc.weight^T
    bfc = jax.random.uniform(k_bfc, (1, D), dtype=jnp.float32,
                             minval=-1.0, maxval=1.0) * (1.0 / D ** 0.5)        # Attention fc.bias
    att = (jax.random.normal(k_att, (1, D), dtype=jnp.float32) * xav(1, D))     # attention vector

    fwd = jax.jit(mp_encoder_forward)
    z = fwd(h, mps_bf, W, bias, prelu_a, Wfc, bfc, att)
    z = jax.block_until_ready(z)

    z_ref = reference(h, mps, W, bias, prelu_a, Wfc, bfc, att)
    assert z.shape == (N, D)
    # bf16 MXU inputs (adj, h, W, Wfc), bf16 epilogue cast + bf16 embeds storage
    # -> relaxed tolerance vs the pure-f32 reference.
    assert jnp.allclose(z, z_ref, atol=5e-2, rtol=5e-2), "mismatch vs pure-JAX reference"

    print("KERNEL_OK")
</pallas_src>

<mosaic_0001>
module attributes {stable_mosaic.version = 11 : i64} {
  func.func @combine_kernel(%arg0: i32, %arg1: memref<3xf32, #tpu.memory_space<smem>>, %arg2: memref<3x4x128xbf16, #tpu.memory_space<vmem>>, %arg3: memref<4x128xf32, #tpu.memory_space<vmem>>) attributes {dimension_semantics = [#tpu.dimension_semantics<parallel>], iteration_bounds = array<i64: 1>, scalar_prefetch = 0 : i64, scratch_operands = 0 : i64, tpu.core_type = #tpu.core_type<tc>, window_params = [{transform_indices = @transform_0, window_bounds = array<i64: 3>}, {transform_indices = @transform_1, window_bounds = array<i64: 3, 4, 128>}, {transform_indices = @transform_2, window_bounds = array<i64: 4, 128>}]} {
    %c0 = arith.constant 0 : index
    %0 = memref.load %arg1[%c0] : memref<3xf32, #tpu.memory_space<smem>>
    %c0_0 = arith.constant 0 : index
    %c0_1 = arith.constant 0 : index
    %c0_2 = arith.constant 0 : index
    %1 = vector.load %arg2[%c0_0, %c0_1, %c0_2] : memref<3x4x128xbf16, #tpu.memory_space<vmem>>, vector<1x4x128xbf16>
    %2 = vector.shape_cast %1 : vector<1x4x128xbf16> to vector<4x128xbf16>
    %3 = arith.extf %2 : vector<4x128xbf16> to vector<4x128xf32>
    %4 = vector.broadcast %0 : f32 to vector<4x128xf32>
    %5 = arith.mulf %4, %3 : vector<4x128xf32>
    %c1 = arith.constant 1 : index
    %6 = memref.load %arg1[%c1] : memref<3xf32, #tpu.memory_space<smem>>
    %c1_3 = arith.constant 1 : index
    %c0_4 = arith.constant 0 : index
    %c0_5 = arith.constant 0 : index
    %7 = vector.load %arg2[%c1_3, %c0_4, %c0_5] : memref<3x4x128xbf16, #tpu.memory_space<vmem>>, vector<1x4x128xbf16>
    %8 = vector.shape_cast %7 : vector<1x4x128xbf16> to vector<4x128xbf16>
    %9 = arith.extf %8 : vector<4x128xbf16> to vector<4x128xf32>
    %10 = vector.broadcast %6 : f32 to vector<4x128xf32>
    %11 = arith.mulf %10, %9 : vector<4x128xf32>
    %12 = arith.addf %5, %11 : vector<4x128xf32>
    %c2 = arith.constant 2 : index
    %13 = memref.load %arg1[%c2] : memref<3xf32, #tpu.memory_space<smem>>
    %c2_6 = arith.constant 2 : index
    %c0_7 = arith.constant 0 : index
    %c0_8 = arith.constant 0 : index
    %14 = vector.load %arg2[%c2_6, %c0_7, %c0_8] : memref<3x4x128xbf16, #tpu.memory_space<vmem>>, vector<1x4x128xbf16>
    %15 = vector.shape_cast %14 : vector<1x4x128xbf16> to vector<4x128xbf16>
    %16 = arith.extf %15 : vector<4x128xbf16> to vector<4x128xf32>
    %17 = vector.broadcast %13 : f32 to vector<4x128xf32>
    %18 = arith.mulf %17, %16 : vector<4x128xf32>
    %19 = arith.addf %12, %18 : vector<4x128xf32>
    %c0_9 = arith.constant 0 : index
    %c0_10 = arith.constant 0 : index
    %20 = vector.load %arg3[%c0_9, %c0_10] : memref<4x128xf32, #tpu.memory_space<vmem>>, vector<4x128xf32>
    tpu.vector_store %arg3[%c0_9, %c0_10], %19 {strides = array<i32>} : memref<4x128xf32, #tpu.memory_space<vmem>>, vector<4x128xf32>,
    return
  }
  func.func @transform_0(%arg0: i32) -> i32 {
    %c0_i32 = arith.constant 0 : i32
    %c0_i32_0 = arith.constant 0 : i32
    return %c0_i32 : i32
  }
  func.func @transform_1(%arg0: i32) -> (i32, i32, i32) {
    %c0_i32 = arith.constant 0 : i32
    %c0_i32_0 = arith.constant 0 : i32
    %c0_i32_1 = arith.constant 0 : i32
    return %c0_i32, %arg0, %c0_i32_0 : i32, i32, i32
  }
  func.func @transform_2(%arg0: i32) -> (i32, i32) {
    %c0_i32 = arith.constant 0 : i32
    %c0_i32_0 = arith.constant 0 : i32
    return %arg0, %c0_i32 : i32, i32
  }
}

module attributes {stable_mosaic.version = 11 : i64} {
  func.func @gcn_score_kernel(%arg0: i32, %arg1: i32, %arg2: i32, %arg3: memref<3xf32, #tpu.memory_space<smem>>, %arg4: memref<1x16x16xbf16, #tpu.memory_space<vmem>>, %arg5: memref<16x32xbf16, #tpu.memory_space<vmem>>, %arg6: memref<1x32x32xbf16, #tpu.memory_space<vmem>>, %arg7: memref<1x1x32xf32, #tpu.memory_space<vmem>>, %arg8: memref<32x32xbf16, #tpu.memory_space<vmem>>, %arg9: memref<1x32xf32, #tpu.memory_space<vmem>>, %arg10: memref<1x32xf32, #tpu.memory_space<vmem>>, %arg11: memref<1x16x32xbf16, #tpu.memory_space<vmem>>, %arg12: memref<1x1x1x128xf32, #tpu.memory_space<vmem>>, %arg13: memref<16x32xf32, #tpu.memory_space<vmem>>) attributes {dimension_semantics = [#tpu.dimension_semantics<parallel>, #tpu.dimension_semantics<parallel>, #tpu.dimension_semantics<arbitrary>], iteration_bounds = array<i64: 1, 3, 1>, scalar_prefetch = 0 : i64, scratch_operands = 1 : i64, tpu.core_type = #tpu.core_type<tc>, window_params = [{transform_indices = @transform_0, window_bounds = array<i64: 3>}, {transform_indices = @transform_1, window_bounds = array<i64: 1, 16, 16>}, {transform_indices = @transform_2, window_bounds = array<i64: 16, 32>}, {transform_indices = @transform_3, window_bounds = array<i64: 1, 32, 32>}, {transform_indices = @transform_4, window_bounds = array<i64: 1, 1, 32>}, {pipeline_mode = #tpu.pipeline_mode<synchronous>, transform_indices = @transform_5, window_bounds = array<i64: 32, 32>}, {pipeline_mode = #tpu.pipeline_mode<synchronous>, transform_indices = @transform_6, window_bounds = array<i64: 1, 32>}, {pipeline_mode = #tpu.pipeline_mode<synchronous>, transform_indices = @transform_7, window_bounds = array<i64: 1, 32>}, {transform_indices = @transform_8, window_bounds = array<i64: 1, 16, 32>}, {transform_indices = @transform_9, window_bounds = array<i64: 1, 1, 1, 128>}]} {
    %c0_i32 = arith.constant 0 : i32
    %0 = arith.cmpi eq, %arg2, %c0_i32 : i32
    %1 = arith.extui %0 : i1 to i32
    %c0_i32_0 = arith.constant 0 : i32
    %2 = arith.cmpi ne, %1, %c0_i32_0 : i32
    scf.if %2 {
      %cst_11 = arith.constant 0.000000e+00 : f32
      %13 = vector.broadcast %cst_11 : f32 to vector<16x32xf32>
      %c0_12 = arith.constant 0 : index
      %c0_13 = arith.constant 0 : index
      %14 = vector.load %arg13[%c0_12, %c0_13] : memref<16x32xf32, #tpu.memory_space<vmem>>, vector<16x32xf32>
      tpu.vector_store %arg13[%c0_12, %c0_13], %13 {strides = array<i32>} : memref<16x32xf32, #tpu.memory_space<vmem>>, vector<16x32xf32>,
    } else {
    }
    %c0 = arith.constant 0 : index
    %c0_1 = arith.constant 0 : index
    %3 = vector.load %arg13[%c0, %c0_1] : memref<16x32xf32, #tpu.memory_space<vmem>>, vector<16x32xf32>
    %c0_2 = arith.constant 0 : index
    %c0_3 = arith.constant 0 : index
    %c0_4 = arith.constant 0 : index
    %4 = vector.load %arg4[%c0_2, %c0_3, %c0_4] : memref<1x16x16xbf16, #tpu.memory_space<vmem>>, vector<1x16x16xbf16>
    %5 = vector.shape_cast %4 : vector<1x16x16xbf16> to vector<16x16xbf16>
    %c0_5 = arith.constant 0 : index
    %c0_6 = arith.constant 0 : index
    %6 = vector.load %arg5[%c0_5, %c0_6] : memref<16x32xbf16, #tpu.memory_space<vmem>>, vector<16x32xbf16>
    %cst = arith.constant dense<0.000000e+00> : vector<16x32xf32>
    %7 = tpu.matmul %5, %6, %cst {dimension_numbers = #tpu.dot_dimension_numbers<[1], [0], [0], [1], [0, 0, 1, 1], [], []>} : vector<16x16xbf16>, vector<16x32xbf16>, vector<16x32xf32> -> vector<16x32xf32>
    %8 = arith.addf %3, %7 : vector<16x32xf32>
    %c0_7 = arith.constant 0 : index
    %c0_8 = arith.constant 0 : index
    %9 = vector.load %arg13[%c0_7, %c0_8] : memref<16x32xf32, #tpu.memory_space<vmem>>, vector<16x32xf32>
    tpu.vector_store %arg13[%c0_7, %c0_8], %8 {strides = array<i32>} : memref<16x32xf32, #tpu.memory_space<vmem>>, vector<16x32xf32>,
    %c0_i32_9 = arith.constant 0 : i32
    %10 = arith.cmpi eq, %arg2, %c0_i32_9 : i32
    %11 = arith.extui %10 : i1 to i32
    %c0_i32_10 = arith.constant 0 : i32
    %12 = arith.cmpi ne, %11, %c0_i32_10 : i32
    scf.if %12 {
      %c0_11 = arith.constant 0 : index
      %c0_12 = arith.constant 0 : index
      %13 = vector.load %arg13[%c0_11, %c0_12] : memref<16x32xf32, #tpu.memory_space<vmem>>, vector<16x32xf32>
      %14 = arith.truncf %13 : vector<16x32xf32> to vector<16x32xbf16>
      %c0_13 = arith.constant 0 : index
      %c0_14 = arith.constant 0 : index
      %c0_15 = arith.constant 0 : index
      %15 = vector.load %arg6[%c0_13, %c0_14, %c0_15] : memref<1x32x32xbf16, #tpu.memory_space<vmem>>, vector<1x32x32xbf16>
      %16 = vector.shape_cast %15 : vector<1x32x32xbf16> to vector<32x32xbf16>
      %cst_16 = arith.constant dense<0.000000e+00> : vector<16x32xf32>
      %17 = tpu.matmul %14, %16, %cst_16 {dimension_numbers = #tpu.dot_dimension_numbers<[1], [0], [0], [1], [0, 0, 1, 1], [], []>} : vector<16x32xbf16>, vector<32x32xbf16>, vector<16x32xf32> -> vector<16x32xf32>
      %c0_17 = arith.constant 0 : index
      %c0_18 = arith.constant 0 : index
      %c0_19 = arith.constant 0 : index
      %18 = vector.load %arg7[%c0_17, %c0_18, %c0_19] : memref<1x1x32xf32, #tpu.memory_space<vmem>>, vector<1x1x32xf32>
      %19 = vector.shape_cast %18 : vector<1x1x32xf32> to vector<32xf32>
      %20 = vector.shape_cast %19 : vector<32xf32> to vector<1x32xf32>
      %21 = vector.broadcast %20 : vector<1x32xf32> to vector<16x32xf32>
      %22 = arith.addf %17, %21 : vector<16x32xf32>
      %23 = arith.index_cast %arg1 : i32 to index
      %24 = memref.load %arg3[%23] : memref<3xf32, #tpu.memory_space<smem>>
      %cst_20 = arith.constant 0.000000e+00 : f32
      %25 = vector.broadcast %cst_20 : f32 to vector<16x32xf32>
      %26 = arith.cmpf ogt, %22, %25 : vector<16x32xf32>
      %27 = vector.broadcast %24 : f32 to vector<16x32xf32>
      %28 = arith.mulf %27, %22 : vector<16x32xf32>
      %29 = arith.select %26, %22, %28 : vector<16x32xi1>, vector<16x32xf32>
      %30 = arith.truncf %29 : vector<16x32xf32> to vector<16x32xbf16>
      %c0_21 = arith.constant 0 : index
      %c0_22 = arith.constant 0 : index
      %c0_23 = arith.constant 0 : index
      %31 = vector.load %arg11[%c0_21, %c0_22, %c0_23] : memref<1x16x32xbf16, #tpu.memory_space<vmem>>, vector<1x16x32xbf16>
      %32 = vector.shape_cast %31 : vector<1x16x32xbf16> to vector<16x32xbf16>
      %33 = vector.shape_cast %30 : vector<16x32xbf16> to vector<1x16x32xbf16>
      tpu.vector_store %arg11[%c0_21, %c0_22, %c0_23], %33 {strides = array<i32>} : memref<1x16x32xbf16, #tpu.memory_space<vmem>>, vector<1x16x32xbf16>,
      %c0_24 = arith.constant 0 : index
      %c0_25 = arith.constant 0 : index
      %34 = vector.load %arg8[%c0_24, %c0_25] : memref<32x32xbf16, #tpu.memory_space<vmem>>, vector<32x32xbf16>
      %cst_26 = arith.constant dense<0.000000e+00> : vector<16x32xf32>
      %35 = tpu.matmul %30, %34, %cst_26 {dimension_numbers = #tpu.dot_dimension_numbers<[1], [0], [0], [1], [0, 0, 1, 1], [], []>} : vector<16x32xbf16>, vector<32x32xbf16>, vector<16x32xf32> -> vector<16x32xf32>
      %c0_27 = arith.constant 0 : index
      %c0_28 = arith.constant 0 : index
      %36 = vector.load %arg9[%c0_27, %c0_28] : memref<1x32xf32, #tpu.memory_space<vmem>>, vector<1x32xf32>
      %37 = vector.broadcast %36 : vector<1x32xf32> to vector<16x32xf32>
      %38 = arith.addf %35, %37 : vector<16x32xf32>
      %39 = math.tanh %38 : vector<16x32xf32>
      %c0_29 = arith.constant 0 : index
      %c0_30 = arith.constant 0 : index
      %40 = vector.load %arg10[%c0_29, %c0_30] : memref<1x32xf32, #tpu.memory_space<vmem>>, vector<1x32xf32>
      %41 = vector.broadcast %40 : vector<1x32xf32> to vector<16x32xf32>
      %42 = arith.mulf %41, %39 : vector<16x32xf32>
      %43 = vector.shape_cast %42 : vector<16x32xf32> to vector<1x16x32xf32>
      %cst_31 = arith.constant dense<0.000000e+00> : vector<1xf32>
      %44 = vector.multi_reduction <add>, %43, %cst_31 [1, 2] : vector<1x16x32xf32> to vector<1xf32>
      %45 = vector.shape_cast %44 : vector<1xf32> to vector<1x1x1xf32>
      %46 = vector.extract %45[0, 0, 0] : f32 from vector<1x1x1xf32>
      %47 = vector.broadcast %46 : f32 to vector<1x1x1x128xf32>
      %c0_32 = arith.constant 0 : index
      %c0_33 = arith.constant 0 : index
      %c0_34 = arith.constant 0 : index
      %c0_35 = arith.constant 0 : index
      %48 = vector.load %arg12[%c0_32, %c0_33, %c0_34, %c0_35] : memref<1x1x1x128xf32, #tpu.memory_space<vmem>>, vector<1x1x1x128xf32>
      tpu.vector_store %arg12[%c0_32, %c0_33, %c0_34, %c0_35], %47 {strides = array<i32>} : memref<1x1x1x128xf32, #tpu.memory_space<vmem>>, vector<1x1x1x128xf32>,
    } else {
    }
    return
  }
  func.func @transform_0(%arg0: i32, %arg1: i32, %arg2: i32) -> i32 {
    %c0_i32 = arith.constant 0 : i32
    %c0_i32_0 = arith.constant 0 : i32
    return %c0_i32 : i32
  }
  func.func @transform_1(%arg0: i32, %arg1: i32, %arg2: i32) -> (i32, i32, i32) {
    %c0_i32 = arith.constant 0 : i32
    return %arg1, %arg0, %arg2 : i32, i32, i32
  }
  func.func @transform_2(%arg0: i32, %arg1: i32, %arg2: i32) -> (i32, i32) {
    %c0_i32 = arith.constant 0 : i32
    %c0_i32_0 = arith.constant 0 : i32
    return %arg2, %c0_i32 : i32, i32
  }
  func.func @transform_3(%arg0: i32, %arg1: i32, %arg2: i32) -> (i32, i32, i32) {
    %c0_i32 = arith.constant 0 : i32
    %c0_i32_0 = arith.constant 0 : i32
    %c0_i32_1 = arith.constant 0 : i32
    return %arg1, %c0_i32, %c0_i32_0 : i32, i32, i32
  }
  func.func @transform_4(%arg0: i32, %arg1: i32, %arg2: i32) -> (i32, i32, i32) {
    %c0_i32 = arith.constant 0 : i32
    %c0_i32_0 = arith.constant 0 : i32
    %c0_i32_1 = arith.constant 0 : i32
    return %arg1, %c0_i32, %c0_i32_0 : i32, i32, i32
  }
  func.func @transform_5(%arg0: i32, %arg1: i32, %arg2: i32) -> (i32, i32) {
    %c0_i32 = arith.constant 0 : i32
    %c0_i32_0 = arith.constant 0 : i32
    %c0_i32_1 = arith.constant 0 : i32
    return %c0_i32, %c0_i32_0 : i32, i32
  }
  func.func @transform_6(%arg0: i32, %arg1: i32, %arg2: i32) -> (i32, i32) {
    %c0_i32 = arith.constant 0 : i32
    %c0_i32_0 = arith.constant 0 : i32
    %c0_i32_1 = arith.constant 0 : i32
    return %c0_i32, %c0_i32_0 : i32, i32
  }
  func.func @transform_7(%arg0: i32, %arg1: i32, %arg2: i32) -> (i32, i32) {
    %c0_i32 = arith.constant 0 : i32
    %c0_i32_0 = arith.constant 0 : i32
    %c0_i32_1 = arith.constant 0 : i32
    return %c0_i32, %c0_i32_0 : i32, i32
  }
  func.func @transform_8(%arg0: i32, %arg1: i32, %arg2: i32) -> (i32, i32, i32) {
    %c0_i32 = arith.constant 0 : i32
    %c0_i32_0 = arith.constant 0 : i32
    return %arg1, %arg0, %c0_i32 : i32, i32, i32
  }
  func.func @transform_9(%arg0: i32, %arg1: i32, %arg2: i32) -> (i32, i32, i32, i32) {
    %c0_i32 = arith.constant 0 : i32
    %c0_i32_0 = arith.constant 0 : i32
    %c0_i32_1 = arith.constant 0 : i32
    return %arg1, %arg0, %c0_i32, %c0_i32_0 : i32, i32, i32, i32
  }
}

</mosaic_0001>

<bundles_post_ra>
// kernel: mp_encoder_forward.3
= control target key start
LH: loop header
LB: loop body
LE: loop exit
PB: predicated region body
PF: predicated region fallthrough
CT: control target
= control target key end

     0   :  { %7 = vsyncpa [#allocation3], 0  ;;  %s68_s12 = smov [#allocation2]   ;;  %s99_s0 = inlined_call_operand.vmem [shape: f32[3], index: 0, kind: input, shape index: {}]   ;;  %s100_s1 = inlined_call_operand.vmem [shape: bf16[3,4,128], index: 1, kind: input, shape index: {}]   ;;  %s101_s2 = inlined_call_operand.vmem [shape: f32[4,128], index: 2, kind: output, shape index: {}]  }
   0x1   :  { %s13_s11 = sshll.u32 %s99_s0, 4  ;;  %s14_s11 = int_to_ptr.vmem [resolvable:$true] %s13_s11 }
   0x2   :  { %16 = dma.vmem_to_smem %s14_s11, 16, %s68_s12, [#allocation3]  }
   0x3   :  { %66 = dma.done.wait [#allocation3], 16  }
   0x4   :  { %67 = vsyncadd [#allocation3], 4294967280 }
   0x5   :  { %23 = sfence }
   0x6   :  { %s24_s13 = sld [smem:[#allocation2]]  ;;  %v25_v0 = vld [vmem:[%s100_s1] sm:$0x3]  ;;  %v50_v1 = vld [vmem:[%s100_s1 + $0x2] sm:$0x3] }
   0x7   :  { %s49_s16 = sld [smem:[#allocation2 + $0x1]]  ;;  %v52_v2 = vld [vmem:[%s100_s1 + $0x4] sm:$0x3]  ;;  %v26_v3 = vunpack.c.l.bf16 %v25_v0  ;;  %v32_v4 = vunpack.c.l.bf16 %v50_v1 }
   0x8   :  { %s51_s19 = sld [smem:[#allocation2 + $0x2]]  ;;  %v39_v5 = vunpack.c.l.bf16 %v52_v2 }
   0xc   :  { %v27_v6 = vstv %s24_s13 }
   0xd   :  { %v28_v7 = vmul.f32 %v27_v6, %v26_v3  ;;  %v33_v8 = vstv %s49_s16 }
   0xe   :  { %v34_v9 = vmul.f32 %v33_v8, %v32_v4  ;;  %v40_v10 = vstv %s51_s19 }
   0xf   :  { %v41_v11 = vmul.f32 %v40_v10, %v39_v5 }
  0x10   :  { %v35_v12 = vadd.f32 %v34_v9, %v28_v7 }
  0x12   :  { %v42_v13 = vadd.f32 %v41_v11, %v35_v12 }
  0x14   :  { %43 = vst [vmem:[%s101_s2] sm:$0xf] %v42_v13 }
  0x15   :  { %48 = vsyncpa [#allocation3], 1 }

// kernel: mp_encoder_forward.2
= control target key start
LH: loop header
LB: loop body
LE: loop exit
PB: predicated region body
PF: predicated region fallthrough
CT: control target
= control target key end

     0   :  { %15 = vsyncpa [#allocation4], 0  ;;  %s1013_s30 = smov 0   ;;  %s1015_s10 = smov 0   ;;  %s1097_s0 = inlined_call_operand.vmem [shape: f32[3], index: 0, kind: input, shape index: {}]   ;;  %s1098_s1 = inlined_call_operand.vmem [shape: bf16[3,16,16], index: 1, kind: input, shape index: {}]   ;;  %s1099_s2 = inlined_call_operand.vmem [shape: bf16[16,32], index: 2, kind: input, shape index: {}]   ;;  %s1100_s3 = inlined_call_operand.vmem [shape: bf16[3,32,32], index: 3, kind: input, shape index: {}]   ;;  %s1101_s4 = inlined_call_operand.vmem [shape: f32[3,1,32], index: 4, kind: input, shape index: {}]   ;;  %s1102_s5 = inlined_call_operand.vmem [shape: bf16[32,32], index: 5, kind: input, shape index: {}]   ;;  %s1103_s6 = inlined_call_operand.vmem [shape: f32[1,32], index: 6, kind: input, shape index: {}]   ;;  %s1104_s7 = inlined_call_operand.vmem [shape: f32[1,32], index: 7, kind: input, shape index: {}]   ;;  %s1105_s8 = inlined_call_operand.vmem [shape: bf16[3,16,32], index: 8, kind: output, shape index: {0}]   ;;  %s1106_s9 = inlined_call_operand.vmem [shape: f32[3,1,1,128], index: 9, kind: output, shape index: {1}]  }
   0x1   :  { %s1017_s11 = smov 0  }
   0x2 LB: > { %s821_s12 = sadd.s32 4294967295, %s959_s11   ;;  %s36_s13 = sadd.s32 1, %s955_s10  ;;  %s959_s11 = sphi %s1017_s11, %s21_s11   ;;  %s955_s10 = sphi %s1015_s10, %s1108_s10   ;;  %s951_s30 = sphi %s1013_s30, %s1107_s30  }
   0x3   : > { %p38_p0 = scmp.ge.s32.totalorder %s36_s13, 3  ;;  %p823_p1 = scmp.ge.s32.totalorder %s959_s11, 1 }
   0x4   : > { %p293_p2 = scmp.lt.s32.totalorder %s959_s11, 4  ;;  %p883_p4 = scmp.eq.s32.totalorder %s821_s12, 0 }
   0x5   : > { %s1110_s13 = smov (%p38_p0, %s36_s13), 0  ;;  %s305_s16 = sshll.u32 %s1097_s0, 4  ;;  %s306_s16 = int_to_ptr.vmem [resolvable:$true] %s305_s16 }
   0x6   : > { %p294_p3 = pnand %p823_p1, %p293_p2  ;;  %s961_s17 = smov [#allocation3]  }
   0x8   : > { %p879_p5 = pneg %p294_p3  ;;  %366 = sbr.rel (%p294_p3) target bundleno = 648 (0x288), region = 52 }
   0xa   : > { %p880_p6 = pnand %p883_p4, %p879_p5 }
   0xc   : > { %882 = dma.vmem_to_smem (!%p880_p6), %s306_s16, 16, %s961_s17, [#allocation4]  }
   0xd   : > { %946 = dma.done.wait (%p883_p4), [#allocation4], 16  }
   0xe   : > { %948 = vsyncadd (%p883_p4), [#allocation4], 4294967280 }
   0xf   : > { %373 = sfence }
  0x10   : > { %v868_v0 = vld [vmem:[%s1099_s2] sm:$0xff]  ;;  %p435_p7 = scmp.lt.s32.totalorder %s951_s30, 2  ;;  %vm482_vm0 = vcmask 261120   ;;  %v962_v1 = vmov 0.0   ;;  %vm502_vm1 = vcmask 130048   ;;  %v872_v14 = vld [vmem:[%s1102_s5 + $0x8] sm:$0xff] }
  0x11   : > { %483 = vst.msk [vmem:[#allocation2] sm:$0xff] %vm482_vm0, %v962_v1  ;;  %513 = vmatpush.bf16.msra.mxu0 %v868_v0  ;;  %615 = vmatpush.bf16.msra.mxu2 %v872_v14  ;;  %v871_v15 = vld [vmem:[%s1102_s5] sm:$0xff]  ;;  %s568_s19 = sld [smem:[#allocation3 + %s951_s30]]  ;;  %vm578_vm3 = vcmask 257024  }
  0x12   : > { %s1043_s20 = scalar_select %p435_p7, %s951_s30, 2  ;;  %484 = vst.msk [vmem:[#allocation2 + $0x8] sm:$0xff] %vm482_vm0, %v962_v1  ;;  %v912_v31 = vld [vmem:[%s1103_s6] ss:$0 sm:$0xff] }
  0x13   : > { %v913_v36 = vld [vmem:[%s1104_s7] ss:$0 sm:$0xff] }
  0x14   : > { %s864_s21 = sshll.u32 %s1043_s20, 3  ;;  %s460_s27 = scalar_lea.vmem %s1101_s4, %s1043_s20 }
  0x15   : > { %s445_s24 = scalar_lea.vmem %s1098_s1, %s864_s21  ;;  %s865_s28 = sshll.u32 %s1043_s20, 4  ;;  %616 = vmatpush.bf16.msra.mxu2 %v871_v15  ;;  %v911_v16 = vld [vmem:[%s460_s27] ss:$0 sm:$0xff] }
  0x16   : > { %v867_v2 = vld [vmem:[%s445_s24] sm:$0xff]  ;;  %s457_s14 = scalar_lea.vmem %s1100_s3, %s865_s28  ;;  %s469_s24 = scalar_lea.vmem %s1105_s8, %s864_s21 }
  0x17   : > { %843 = vmatmul.msk.bf16.vlgmr.msra.gmra.mxu0 %vm502_vm1, %v867_v2  ;;  %v870_v3 = vld [vmem:[%s457_s14 + $0x8] sm:$0xff]  ;;  %v869_v4 = vld [vmem:[%s457_s14] sm:$0xff]  ;;  %v571_v18 = vstv %s568_s19  ;;  %s476_s29 = scalar_lea.vmem %s1106_s9, %s1043_s20 }
  0x18   : > { %560 = vmatpush.bf16.msra.mxu1 %v870_v3  ;;  %v485_v5 = vld [vmem:[#allocation2] sm:$0xff] }
  0x19   : > { %v486_v8 = vld [vmem:[#allocation2 + $0x8] sm:$0xff] }
  0x1c   : > { %561 = vmatpush.bf16.msra.mxu1 %v869_v4 }
  0x94   : > { %v515_v6 = vpop.f32.mrf.mxu0 }
  0x95   : > { %v520_v7 = vadd.f32 %v515_v6, %v485_v5 }
  0x97   : > { %523 = vst.msk [vmem:[#allocation2] sm:$0xff] %vm482_vm0, %v520_v7 }
  0x9c   : > { %v517_v9 = vpop.f32.mrf.mxu0 }
  0x9d   : > { %v521_v10 = vadd.f32 %v517_v9, %v486_v8 }
  0x9e   : > { %v528_v11 = vld [vmem:[#allocation2] sm:$0xff] }
  0x9f   : > { %524 = vst.msk [vmem:[#allocation2 + $0x8] sm:$0xff] %vm482_vm0, %v521_v10 }
  0xa6   : > { %v529_v12 = vld [vmem:[#allocation2 + $0x8] sm:$0xff] }
  0xa7   : > { %v530_v13 = vpack.c.bf16 %v529_v12, %v528_v11 }
  0xa9   : > { %852 = vmatmul.msk.bf16.vlgmr.msra.gmra.mxu1 %vm482_vm0, %v530_v13 }
 0x126   : > { %v563_v17 = vpop.f32.mrf.mxu1 }
 0x127   : > { %v564_v19 = vadd.f32 %v911_v16, %v563_v17 }
 0x129   : > { %vm569_vm2 = vcmp.gt.f32.partialorder %v564_v19, 0.0  ;;  %v572_v20 = vmul.f32 %v571_v18, %v564_v19 }
 0x12b   : > { %v574_v21 = vsel %vm569_vm2, %v564_v19, %v572_v20 }
 0x12c   : > { %v576_v22 = vpack.c.bf16 %v574_v21, %v574_v21 }
 0x12e   : > { %579 = vst.msk [vmem:[%s469_s24] sm:$0xf] %vm578_vm3, %v576_v22  ;;  %v565_v23 = vpop.f32.mrf.mxu1  ;;  %v591_v28 = vunpack.c.l.b16 %v576_v22 }
 0x12f   : > { %v566_v24 = vadd.f32 %v911_v16, %v565_v23 }
 0x131   : > { %vm570_vm4 = vcmp.gt.f32.partialorder %v566_v24, 0.0  ;;  %v573_v25 = vmul.f32 %v571_v18, %v566_v24 }
 0x133   : > { %v575_v26 = vsel %vm570_vm4, %v566_v24, %v573_v25 }
 0x134   : > { %v577_v27 = vpack.c.bf16 %v575_v26, %v575_v26 }
 0x136   : > { %580 = vst.msk [vmem:[%s469_s24 + $0x4] sm:$0xf] %vm578_vm3, %v577_v27  ;;  %v592_v29 = vunpack.c.l.b16 %v577_v27 }
 0x138   : > { %v593_v30 = vpack.c.b16 %v592_v29, %v591_v28 }
 0x13a   : > { %861 = vmatmul.msk.bf16.vlgmr.msra.gmra.mxu2 %vm482_vm0, %v593_v30 }
 0x1bd   : > { %v618_v32 = vpop.f32.mrf.mxu2 }
 0x1be   : > { %v619_v33 = vadd.f32 %v912_v31, %v618_v32 }
 0x1c0   : > { %914 = vtanh.f32 %v619_v33 }
 0x1c5   : > { %v620_v34 = vpop.f32.mrf.mxu2 }
 0x1c6   : > { %v621_v35 = vadd.f32 %v912_v31, %v620_v34  ;;  %v915_v37 = vpop.eup %914 }
 0x1c7   : > { %v629_v38 = vmul.f32 %v915_v37, %v913_v36 }
 0x1c8   : > { %916 = vtanh.f32 %v621_v35 }
 0x1c9   : > { %v631_v41 = vsel %vm482_vm0, %v629_v38, 0.0 }
 0x1ce   : > { %v917_v39 = vpop.eup %916 }
 0x1cf   : > { %v630_v40 = vmul.f32 %v917_v39, %v913_v36 }
 0x1d1   : > { %v632_v42 = vsel %vm482_vm0, %v630_v40, 0.0 }
 0x1d2   : > { %v633_v43 = vadd.f32 %v632_v42, %v631_v41 }
 0x1d4   : > { %634 = vadd.xlane.f32.xlu0 %v633_v43 }
 0x247   : > { %v635_v44 = vpop.xlane.xlu0 %634 }
 0x248   : > { %v636_v45 = vrot.slane %v635_v44, 4 }
 0x24a   : > { %v637_v46 = vadd.f32 %v636_v45, %v635_v44 }
 0x24c   : > { %v638_v47 = vrot.slane %v637_v46, 2 }
 0x24e   : > { %v639_v48 = vadd.f32 %v638_v47, %v637_v46 }
 0x250   : > { %v640_v49 = vrot.slane %v639_v48, 1 }
 0x252   : > { %v641_v50 = vadd.f32 %v640_v49, %v639_v48 }
 0x254   : > { %873 = vpush %v641_v50 }
 0x285   : > { %s874_s12 = spop %873 }
 0x286   : > { %v643_v51 = vstv %s874_s12 }
 0x287   : > { %644 = vst [vmem:[%s476_s29] sm:$0x1] %v643_v51 }
 0x288 PF: > { %s21_s11 = sadd.s32 1, %s959_s11   ;;  %s1107_s30 = smov %s955_s10 }
 0x289   : > { %p18_p8 = scmp.ge.s32.totalorder %s21_s11, 5   ;;  %s1108_s10 = smov %s1110_s13 }
 0x28b   :  { %20 = sbr.rel (!%p18_p8) target bundleno = 2 (0x2), region = 116 }
 0x290   :  { %693 = vsyncpa [#allocation4], 1 }
 0x291   :  { %695 = vsyncpa [#allocation4 + $0x1], 1 }

</bundles_post_ra>
